<compile_context>
chip_gen: v7x
topology: tpu7x:2x2x1
jax: 0.10.0
libtpu: 0.0.40
codegen_flags: <defaults>
</compile_context>

<pallas_src>
import jax
import jax.numpy as jnp
from jax.experimental import pallas as pl
from jax.experimental.pallas import tpu as pltpu


def _round_up(x, m):
    return (x + m - 1) // m * m


def incremental_net_head_kernel(pooled_ref, w_emb_ref, b_emb_ref,
                                w_fc_ref, b_fc_ref,
                                feat_ref, logits_ref):
    """Fused affine-backbone embedding + SimpleLinear head for one batch tile.

    pooled_ref : (Bt, Kp)   bf16  token-mean-pooled flattened patches
    w_emb_ref  : (Kp, Dp)   bf16  patch-embedding weight (lane padded)
    b_emb_ref  : (1, Dp)    f32   patch-embedding bias
    w_fc_ref   : (Dp, NCp)  bf16  classifier weight (transposed vs torch, padded)
    b_fc_ref   : (1, NCp)   f32   classifier bias
    feat_ref   : (Bt, Dp)   f32   output features
    logits_ref : (Bt, NCp)  f32   output logits
    """
    # features = mean_n(patches) @ W_emb + b_emb   (affine stand-in backbone)
    feats = jnp.dot(pooled_ref[...], w_emb_ref[...],
                    preferred_element_type=jnp.float32) + b_emb_ref[...]
    feat_ref[...] = feats.astype(feat_ref.dtype)

    # SimpleLinear head: logits = feats @ W_fc + b_fc   (== F.linear(x, W, b))
    logits = jnp.dot(feats.astype(w_fc_ref.dtype), w_fc_ref[...],
                     preferred_element_type=jnp.float32) + b_fc_ref[...]
    logits_ref[...] = logits.astype(logits_ref.dtype)


def incremental_net_forward(x, params, *, patch_size, batch_tile=128,
                            compute_dtype=jnp.bfloat16):
    """x: (B, C, H, W) NCHW float32.  Returns dict {'logits', 'features'}."""
    B, C, H, W = x.shape
    P = patch_size
    assert H % P == 0 and W % P == 0
    N = (H // P) * (W // P)
    K = C * P * P

    w_emb, b_emb, w_fc, b_fc = (params["w_emb"], params["b_emb"],
                                params["w_fc"], params["b_fc"])
    D = w_emb.shape[1]
    NC = w_fc.shape[1]

    # Glue (stays in XLA, fused with the mean below): NCHW -> (B, N, K) patch
    # flattening matching nn.Conv2d(P, stride=P) weight ordering, then an f32
    # token mean.  The mean commutes with the affine embedding
    #   mean_n(patches @ W + b) == mean_n(patches) @ W + b
    # so the kernel only ever sees the (B, K) pooled tensor -> no duplicate
    # HBM pass over the big patch tensor.
    patches = (x.reshape(B, C, H // P, P, W // P, P)
                 .transpose(0, 2, 4, 1, 3, 5)
                 .reshape(B, N, K))
    pooled = jnp.mean(patches.astype(jnp.float32), axis=1)            # (B, K) f32

    # Lane/sublane-dense padded sizes: batch tile multiple of 8 sublanes (and
    # capped by the 8-aligned batch so tiny inputs aren't over-padded),
    # K / D / nb_classes padded to 128 lanes (dense MXU operands, unmasked vst).
    Bt = max(8, min(_round_up(batch_tile, 8), _round_up(B, 8)))
    Bp = _round_up(B, Bt)
    Kp = _round_up(K, 128)
    Dp = _round_up(D, 128)
    NCp = _round_up(NC, 128)

    # bf16 matmul operands (f32 accumulation in-kernel): half the HBM/VMEM
    # traffic and the bf16 MXU path.  Pooling already happened in f32 above,
    # so features only carry the matmul's bf16 input rounding.
    pooled_p = jnp.pad(pooled, ((0, Bp - B), (0, Kp - K))).astype(compute_dtype)
    w_emb_p = jnp.pad(w_emb, ((0, Kp - K), (0, Dp - D))).astype(compute_dtype)
    b_emb_p = jnp.pad(b_emb, ((0, 0), (0, Dp - D))).astype(jnp.float32)
    w_fc_p = jnp.pad(w_fc, ((0, Dp - D), (0, NCp - NC))).astype(compute_dtype)
    b_fc_p = jnp.pad(b_fc, ((0, 0), (0, NCp - NC))).astype(jnp.float32)

    grid = (Bp // Bt,)
    out_shapes = (jax.ShapeDtypeStruct((Bp, Dp), jnp.float32),    # features
                  jax.ShapeDtypeStruct((Bp, NCp), jnp.float32))   # logits

    feats_p, logits_p = pl.pallas_call(
        incremental_net_head_kernel,
        out_shape=out_shapes,
        grid_spec=pltpu.PrefetchScalarGridSpec(
            num_scalar_prefetch=0,
            grid=grid,
            in_specs=[
                # Batch-tiled pooled input: DMA of tile i+1 overlaps compute of i.
                pl.BlockSpec((Bt, Kp), lambda i: (i, 0)),
                # Weights/biases are loop-invariant -> DMA'd once, VMEM-resident.
                pl.BlockSpec((Kp, Dp), lambda i: (0, 0)),
                pl.BlockSpec((1, Dp), lambda i: (0, 0)),
                pl.BlockSpec((Dp, NCp), lambda i: (0, 0)),
                pl.BlockSpec((1, NCp), lambda i: (0, 0)),
            ],
            out_specs=[
                pl.BlockSpec((Bt, Dp), lambda i: (i, 0)),
                pl.BlockSpec((Bt, NCp), lambda i: (i, 0)),
            ],
        ),
        compiler_params=pltpu.CompilerParams(
            # Independent batch tiles -> shard grid steps across v7x's 2 TCs
            # (needs >= 2 grid steps, i.e. a real batch; no-op for the demo).
            dimension_semantics=("parallel",),
            # Resident working set (bf16 weights + small per-tile operands,
            # double-buffered) is a few MiB even at ViT-B/16 scale with
            # Bt=256, so 32 MiB leaves headroom on all of v5e/v6e/v7x.
            vmem_limit_bytes=32 * 1024 * 1024,
        ),
    )(pooled_p, w_emb_p, b_emb_p, w_fc_p, b_fc_p)

    # Slice the lane/sublane padding back off.
    return {"logits": logits_p[:B, :NC], "features": feats_p[:B, :D]}


def reference_forward(x, params, *, patch_size):
    """Pure-JAX f32 reference (module ordering: per-token embed, then mean)."""
    B, C, H, W = x.shape
    P = patch_size
    N = (H // P) * (W // P)
    K = C * P * P
    patches = (x.reshape(B, C, H // P, P, W // P, P)
                 .transpose(0, 2, 4, 1, 3, 5)
                 .reshape(B, N, K))
    tokens = jnp.einsum("bnk,kd->bnd", patches, params["w_emb"]) + params["b_emb"]
    feats = jnp.mean(tokens, axis=1)
    logits = feats @ params["w_fc"] + params["b_fc"]
    return {"logits": logits, "features": feats}


if __name__ == "__main__":
    # Small shapes consistent with the module's forward:
    #   images NCHW, backbone feature_dim D, classifier nb_classes.
    B, C, H, W = 2, 4, 16, 16
    P = 4                      # patch size for the backbone stand-in
    D = 32                     # feature_dim (module uses 768; scaled down)
    NB_CLASSES = 10            # fc = SimpleLinear(feature_dim, nb_classes)
    K = C * P * P

    key = jax.random.PRNGKey(0)
    kx, k1, k2, k3 = jax.random.split(key, 4)

    x = jax.random.normal(kx, (B, C, H, W), dtype=jnp.float32)

    params = {
        # backbone-lite patch embedding (Conv2d(C, D, P, stride=P) flattened)
        "w_emb": jax.random.normal(k1, (K, D), dtype=jnp.float32) * 0.05,
        "b_emb": jnp.zeros((1, D), dtype=jnp.float32),
        # SimpleLinear head: torch weight is (nb_classes, D); stored transposed
        # (kaiming-uniform-like scale, zero bias as in SimpleLinear.reset_parameters)
        "w_fc": jax.random.normal(k3, (D, NB_CLASSES), dtype=jnp.float32) * (1.0 / jnp.sqrt(D)),
        "b_fc": jnp.zeros((1, NB_CLASSES), dtype=jnp.float32),
    }

    out = incremental_net_forward(x, params, patch_size=P)
    jax.block_until_ready(out)

    ref = reference_forward(x, params, patch_size=P)
    assert out["logits"].shape == (B, NB_CLASSES)
    assert out["features"].shape == (B, D)
    # bf16 matmul operands with f32 accumulation -> compare with bf16-level tol.
    assert jnp.allclose(out["logits"], ref["logits"], atol=2e-2, rtol=2e-2)
    assert jnp.allclose(out["features"], ref["features"], atol=2e-2, rtol=2e-2)

    print("KERNEL_OK")
</pallas_src>

<mosaic_0001>
module attributes {stable_mosaic.version = 11 : i64} {
  func.func @incremental_net_head_kernel(%arg0: i32, %arg1: memref<8x128xbf16, #tpu.memory_space<vmem>>, %arg2: memref<128x128xbf16, #tpu.memory_space<vmem>>, %arg3: memref<1x128xf32, #tpu.memory_space<vmem>>, %arg4: memref<128x128xbf16, #tpu.memory_space<vmem>>, %arg5: memref<1x128xf32, #tpu.memory_space<vmem>>, %arg6: memref<8x128xf32, #tpu.memory_space<vmem>>, %arg7: memref<8x128xf32, #tpu.memory_space<vmem>>) attributes {dimension_semantics = [#tpu.dimension_semantics<parallel>], iteration_bounds = array<i64: 1>, scalar_prefetch = 0 : i64, scratch_operands = 0 : i64, tpu.core_type = #tpu.core_type<tc>, window_params = [{transform_indices = @transform_0, window_bounds = array<i64: 8, 128>}, {pipeline_mode = #tpu.pipeline_mode<synchronous>, transform_indices = @transform_1, window_bounds = array<i64: 128, 128>}, {pipeline_mode = #tpu.pipeline_mode<synchronous>, transform_indices = @transform_2, window_bounds = array<i64: 1, 128>}, {pipeline_mode = #tpu.pipeline_mode<synchronous>, transform_indices = @transform_3, window_bounds = array<i64: 128, 128>}, {pipeline_mode = #tpu.pipeline_mode<synchronous>, transform_indices = @transform_4, window_bounds = array<i64: 1, 128>}, {transform_indices = @transform_5, window_bounds = array<i64: 8, 128>}, {transform_indices = @transform_6, window_bounds = array<i64: 8, 128>}]} {
    %c0 = arith.constant 0 : index
    %c0_0 = arith.constant 0 : index
    %0 = vector.load %arg1[%c0, %c0_0] : memref<8x128xbf16, #tpu.memory_space<vmem>>, vector<8x128xbf16>
    %c0_1 = arith.constant 0 : index
    %c0_2 = arith.constant 0 : index
    %1 = vector.load %arg2[%c0_1, %c0_2] : memref<128x128xbf16, #tpu.memory_space<vmem>>, vector<128x128xbf16>
    %cst = arith.constant dense<0.000000e+00> : vector<8x128xf32>
    %2 = tpu.matmul %0, %1, %cst {dimension_numbers = #tpu.dot_dimension_numbers<[1], [0], [0], [1], [0, 0, 1, 1], [], []>} : vector<8x128xbf16>, vector<128x128xbf16>, vector<8x128xf32> -> vector<8x128xf32>
    %c0_3 = arith.constant 0 : index
    %c0_4 = arith.constant 0 : index
    %3 = vector.load %arg3[%c0_3, %c0_4] : memref<1x128xf32, #tpu.memory_space<vmem>>, vector<1x128xf32>
    %4 = vector.broadcast %3 : vector<1x128xf32> to vector<8x128xf32>
    %5 = arith.addf %2, %4 : vector<8x128xf32>
    %c0_5 = arith.constant 0 : index
    %c0_6 = arith.constant 0 : index
    %6 = vector.load %arg6[%c0_5, %c0_6] : memref<8x128xf32, #tpu.memory_space<vmem>>, vector<8x128xf32>
    tpu.vector_store %arg6[%c0_5, %c0_6], %5 {strides = array<i32>} : memref<8x128xf32, #tpu.memory_space<vmem>>, vector<8x128xf32>,
    %7 = arith.truncf %5 : vector<8x128xf32> to vector<8x128xbf16>
    %c0_7 = arith.constant 0 : index
    %c0_8 = arith.constant 0 : index
    %8 = vector.load %arg4[%c0_7, %c0_8] : memref<128x128xbf16, #tpu.memory_space<vmem>>, vector<128x128xbf16>
    %cst_9 = arith.constant dense<0.000000e+00> : vector<8x128xf32>
    %9 = tpu.matmul %7, %8, %cst_9 {dimension_numbers = #tpu.dot_dimension_numbers<[1], [0], [0], [1], [0, 0, 1, 1], [], []>} : vector<8x128xbf16>, vector<128x128xbf16>, vector<8x128xf32> -> vector<8x128xf32>
    %c0_10 = arith.constant 0 : index
    %c0_11 = arith.constant 0 : index
    %10 = vector.load %arg5[%c0_10, %c0_11] : memref<1x128xf32, #tpu.memory_space<vmem>>, vector<1x128xf32>
    %11 = vector.broadcast %10 : vector<1x128xf32> to vector<8x128xf32>
    %12 = arith.addf %9, %11 : vector<8x128xf32>
    %c0_12 = arith.constant 0 : index
    %c0_13 = arith.constant 0 : index
    %13 = vector.load %arg7[%c0_12, %c0_13] : memref<8x128xf32, #tpu.memory_space<vmem>>, vector<8x128xf32>
    tpu.vector_store %arg7[%c0_12, %c0_13], %12 {strides = array<i32>} : memref<8x128xf32, #tpu.memory_space<vmem>>, vector<8x128xf32>,
    return
  }
  func.func @transform_0(%arg0: i32) -> (i32, i32) {
    %c0_i32 = arith.constant 0 : i32
    %c0_i32_0 = arith.constant 0 : i32
    return %arg0, %c0_i32 : i32, i32
  }
  func.func @transform_1(%arg0: i32) -> (i32, i32) {
    %c0_i32 = arith.constant 0 : i32
    %c0_i32_0 = arith.constant 0 : i32
    %c0_i32_1 = arith.constant 0 : i32
    return %c0_i32, %c0_i32_0 : i32, i32
  }
  func.func @transform_2(%arg0: i32) -> (i32, i32) {
    %c0_i32 = arith.constant 0 : i32
    %c0_i32_0 = arith.constant 0 : i32
    %c0_i32_1 = arith.constant 0 : i32
    return %c0_i32, %c0_i32_0 : i32, i32
  }
  func.func @transform_3(%arg0: i32) -> (i32, i32) {
    %c0_i32 = arith.constant 0 : i32
    %c0_i32_0 = arith.constant 0 : i32
    %c0_i32_1 = arith.constant 0 : i32
    return %c0_i32, %c0_i32_0 : i32, i32
  }
  func.func @transform_4(%arg0: i32) -> (i32, i32) {
    %c0_i32 = arith.constant 0 : i32
    %c0_i32_0 = arith.constant 0 : i32
    %c0_i32_1 = arith.constant 0 : i32
    return %c0_i32, %c0_i32_0 : i32, i32
  }
  func.func @transform_5(%arg0: i32) -> (i32, i32) {
    %c0_i32 = arith.constant 0 : i32
    %c0_i32_0 = arith.constant 0 : i32
    return %arg0, %c0_i32 : i32, i32
  }
  func.func @transform_6(%arg0: i32) -> (i32, i32) {
    %c0_i32 = arith.constant 0 : i32
    %c0_i32_0 = arith.constant 0 : i32
    return %arg0, %c0_i32 : i32, i32
  }
}

</mosaic_0001>

<bundles_post_ra>
// kernel: tpu_custom_call.1
= control target key start
LH: loop header
LB: loop body
LE: loop exit
PB: predicated region body
PF: predicated region fallthrough
CT: control target
= control target key end

     0   :  { %12 = vsyncpa [#allocation3], 0  ;;  %s655_s0 = inlined_call_operand.hbm [shape: bf16[8,128], index: 0, kind: input, shape index: {}]   ;;  %s656_s1 = inlined_call_operand.hbm [shape: bf16[128,128], index: 1, kind: input, shape index: {}]   ;;  %s657_s2 = inlined_call_operand.vmem [shape: f32[1,128], index: 2, kind: input, shape index: {}]   ;;  %s658_s3 = inlined_call_operand.hbm [shape: bf16[128,128], index: 3, kind: input, shape index: {}]   ;;  %s659_s4 = inlined_call_operand.vmem [shape: f32[1,128], index: 4, kind: input, shape index: {}]   ;;  %s660_s5 = inlined_call_operand.hbm [shape: f32[8,128], index: 5, kind: output, shape index: {0}]   ;;  %s661_s6 = inlined_call_operand.hbm [shape: f32[8,128], index: 6, kind: output, shape index: {1}]  }
   0x1   :  { %13 = vsyncpa [#allocation6], 0 }
   0x2   :  { %14 = vsyncpa [#allocation4], 0 }
   0x3   :  { %15 = vsyncpa [#allocation10], 0  ;;  %s539_s21 = smov [#allocation5]   ;;  %s421_s25 = scalar_lea.hbm %s656_s1, 1024 }
   0x4   :  { %s31_s22 = sshll.u32 %s539_s21, 4  ;;  %p422_p0 = scmp.ne.s32.totalorder %s656_s1, %s421_s25  ;;  %s32_s22 = int_to_ptr.vmem [resolvable:$true] %s31_s22 }
   0x5   :  { %p425_p1 = scmp.lt.u32.totalorder %s421_s25, %s656_s1 }
   0x7   :  { %p427_p2 = pnand %p425_p1, %p422_p0 }
   0x9   :  { %430 = shalt.err (!%p427_p2)
}
   0xa   :  { %s431_s30 = scalar_lea.vmem %s32_s22, 1024  ;;  %p436_p4 = scmp.lt.s32.totalorder %s32_s22, %s32_s22 }
   0xb   :  { %p432_p3 = scmp.ne.s32.totalorder %s32_s22, %s431_s30  ;;  %p437_p5 = scmp.lt.s32.totalorder %s431_s30, %s431_s30 }
   0xd   :  { %p438_p6 = por %p437_p5, %p436_p4 }
   0xf   :  { %p439_p7 = pnand %p438_p6, %p432_p3 }
  0x11   :  { %442 = shalt.err (!%p439_p7)
}
  0x12   :  { %s540_s7 = smov 64   ;;  %s541_s8 = smov 4  }
  0x13   :  { %37 = dma.hbm_to_vmem [thread:$0]  %s656_s1, 1024, %s32_s22, [#allocation6], %s540_s7, %s540_s7, %s541_s8  }
  0x14   :  { %s542_s11 = smov [#allocation2]   ;;  %s543_s13 = smov [#allocation7]  }
  0x15   :  { %s22_s12 = sshll.u32 %s542_s11, 4  ;;  %s45_s14 = sshll.u32 %s543_s13, 4  ;;  %s23_s12 = int_to_ptr.vmem [resolvable:$true] %s22_s12  ;;  %s46_s14 = int_to_ptr.vmem [resolvable:$true] %s45_s14 }
  0x16   :  { %s443_s17 = scalar_lea.hbm %s655_s0, 64 }
  0x17   :  { %p444_p8 = scmp.ne.s32.totalorder %s655_s0, %s443_s17  ;;  %p447_p9 = scmp.lt.u32.totalorder %s443_s17, %s655_s0 }
  0x19   :  { %p449_p10 = pnand %p447_p9, %p444_p8 }
  0x1b   :  { %452 = shalt.err (!%p449_p10)
}
  0x1c   :  { %s453_s1 = scalar_lea.vmem %s23_s12, 64  ;;  %p458_p12 = scmp.lt.s32.totalorder %s23_s12, %s23_s12 }
  0x1d   :  { %p454_p11 = scmp.ne.s32.totalorder %s23_s12, %s453_s1  ;;  %p459_p13 = scmp.lt.s32.totalorder %s453_s1, %s453_s1 }
  0x1f   :  { %p460_p0 = por %p459_p13, %p458_p12 }
  0x21   :  { %p461_p1 = pnand %p460_p0, %p454_p11 }
  0x23   :  { %464 = shalt.err (!%p461_p1)
}
  0x24   :  { %25 = dma.hbm_to_vmem [thread:$0]  %s655_s0, 64, %s23_s12, [#allocation3]  }
  0x25   :  { %s465_s26 = scalar_lea.hbm %s658_s3, 1024 }
  0x26   :  { %p466_p2 = scmp.ne.s32.totalorder %s658_s3, %s465_s26  ;;  %p469_p3 = scmp.lt.u32.totalorder %s465_s26, %s658_s3 }
  0x28   :  { %p471_p4 = pnand %p469_p3, %p466_p2 }
  0x2a   :  { %474 = shalt.err (!%p471_p4)
}
  0x2b   :  { %s475_s9 = scalar_lea.vmem %s46_s14, 1024  ;;  %p480_p6 = scmp.lt.s32.totalorder %s46_s14, %s46_s14 }
  0x2c   :  { %p476_p5 = scmp.ne.s32.totalorder %s46_s14, %s475_s9  ;;  %p481_p7 = scmp.lt.s32.totalorder %s475_s9, %s475_s9 }
  0x2e   :  { %p482_p8 = por %p481_p7, %p480_p6 }
  0x30   :  { %p483_p9 = pnand %p482_p8, %p476_p5 }
  0x32   :  { %486 = shalt.err (!%p483_p9)
}
  0x33   :  { %51 = dma.hbm_to_vmem [thread:$0]  %s658_s3, 1024, %s46_s14, [#allocation6], %s540_s7, %s540_s7, %s541_s8  }
  0x34   :  { %531 = dma.done.wait [#allocation3], 64  }
  0x35   :  { %532 = vsyncadd [#allocation3], 4294967232 }
  0x36   :  { %533 = dma.done.wait [#allocation6], 2048  }
  0x37   :  { %534 = vsyncadd [#allocation6], 4294965248  ;;  %v544_v0 = vmov 0.0   ;;  %vm545_vm0 = vmmov 0   ;;  %v405_v1 = vld [vmem:[#allocation5] sm:$0xff]   ;;  %v406_v2 = vld [vmem:[#allocation5 + $0x8] sm:$0xff]  }
  0x38   :  { %356 = vmatprep.subr.bf16.mxu0 %v544_v0  ;;  %372 = vmatprep.mubr.msk.bf16.mxu0 %vm545_vm0, %v544_v0  ;;  %v407_v3 = vld [vmem:[#allocation5 + $0x10] sm:$0xff]   ;;  %v413_v4 = vld [vmem:[#allocation7] sm:$0xff]   ;;  %v408_v5 = vld [vmem:[#allocation5 + $0x18] sm:$0xff]   ;;  %s546_s8 = smov [#allocation8]  }
  0x39   :  { %376 = vmatprep.subr.bf16.mxu1 %v544_v0  ;;  %392 = vmatprep.mubr.msk.bf16.mxu1 %vm545_vm0, %v544_v0  ;;  %v414_v6 = vld [vmem:[#allocation7 + $0x8] sm:$0xff]   ;;  %v409_v7 = vld [vmem:[#allocation5 + $0x20] sm:$0xff]   ;;  %v415_v8 = vld [vmem:[#allocation7 + $0x10] sm:$0xff]   ;;  %s296_s11 = sshll.u32 %s546_s8, 4  ;;  %s297_s11 = int_to_ptr.vmem [resolvable:$true] %s296_s11 }
  0x3a   :  { %357 = vmatpush3.bf16.msra.mxu0 %v405_v1  ;;  %377 = vmatpush3.bf16.msra.mxu1 %v413_v4  ;;  %v410_v9 = vld [vmem:[#allocation5 + $0x28] sm:$0xff]   ;;  %v416_v10 = vld [vmem:[#allocation7 + $0x18] sm:$0xff]   ;;  %v411_v11 = vld [vmem:[#allocation5 + $0x30] sm:$0xff]   ;;  %s487_s12 = scalar_lea.vmem %s297_s11, 128  ;;  %p492_p11 = scmp.lt.s32.totalorder %s297_s11, %s297_s11 }
  0x3b   :  { %358 = vmatprep.subr.bf16.mxu0 %v544_v0  ;;  %378 = vmatprep.subr.bf16.mxu1 %v544_v0  ;;  %v417_v12 = vld [vmem:[#allocation7 + $0x20] sm:$0xff]   ;;  %v412_v13 = vld [vmem:[#allocation5 + $0x38] sm:$0xff]   ;;  %v418_v14 = vld [vmem:[#allocation7 + $0x28] sm:$0xff]   ;;  %p488_p10 = scmp.ne.s32.totalorder %s297_s11, %s487_s12  ;;  %p493_p12 = scmp.lt.s32.totalorder %s487_s12, %s487_s12 }
  0x3c   :  { %v64_v15 = vld [vmem:[#allocation2] sm:$0xf]  ;;  %v419_v16 = vld [vmem:[#allocation7 + $0x30] sm:$0xff]  }
  0x3d   :  { %v420_v17 = vld [vmem:[#allocation7 + $0x38] sm:$0xff]   ;;  %p494_p13 = por %p493_p12, %p492_p11 }
  0x3e   :  { %359 = vmatpush3.bf16.msra.mxu0 %v406_v2  ;;  %379 = vmatpush3.bf16.msra.mxu1 %v414_v6  ;;  %v320_v18 = vld [vmem:[%s657_s2] ss:$0 sm:$0xff] }
  0x3f   :  { %360 = vmatprep.subr.bf16.mxu0 %v544_v0  ;;  %380 = vmatprep.subr.bf16.mxu1 %v544_v0  ;;  %p495_p0 = pnand %p494_p13, %p488_p10 }
  0x42   :  { %361 = vmatpush3.bf16.msra.mxu0 %v407_v3  ;;  %381 = vmatpush3.bf16.msra.mxu1 %v415_v8 }
  0x43   :  { %362 = vmatprep.subr.bf16.mxu0 %v544_v0  ;;  %382 = vmatprep.subr.bf16.mxu1 %v544_v0 }
  0x46   :  { %363 = vmatpush3.bf16.msra.mxu0 %v408_v5  ;;  %383 = vmatpush3.bf16.msra.mxu1 %v416_v10 }
  0x47   :  { %364 = vmatprep.subr.bf16.mxu0 %v544_v0  ;;  %384 = vmatprep.subr.bf16.mxu1 %v544_v0 }
  0x4a   :  { %365 = vmatpush3.bf16.msra.mxu0 %v409_v7  ;;  %385 = vmatpush3.bf16.msra.mxu1 %v417_v12 }
  0x4b   :  { %366 = vmatprep.subr.bf16.mxu0 %v544_v0  ;;  %386 = vmatprep.subr.bf16.mxu1 %v544_v0 }
  0x4e   :  { %367 = vmatpush3.bf16.msra.mxu0 %v410_v9  ;;  %387 = vmatpush3.bf16.msra.mxu1 %v418_v14 }
  0x4f   :  { %368 = vmatprep.subr.bf16.mxu0 %v544_v0  ;;  %388 = vmatprep.subr.bf16.mxu1 %v544_v0 }
  0x52   :  { %369 = vmatpush3.bf16.msra.mxu0 %v411_v11  ;;  %389 = vmatpush3.bf16.msra.mxu1 %v419_v16 }
  0x53   :  { %370 = vmatprep.subr.bf16.mxu0 %v544_v0  ;;  %390 = vmatprep.subr.bf16.mxu1 %v544_v0 }
  0x56   :  { %371 = vmatpush3.bf16.msra.mxu0 %v412_v13  ;;  %391 = vmatpush3.bf16.msra.mxu1 %v420_v17 }
  0x59   :  { %373 = vmatmul.mubr.bf16.vlgmr.msra.gmra.mrb[0].mxu0 %v64_v15 }
 0x12c   :  { %v170_v19 = vpop.f32.mrb[0].mxu0 }
 0x12d   :  { %v171_v20 = vadd.f32 %v320_v18, %v170_v19  ;;  %v374_v21 = vpop.f32.mrb[1].mxu0 }
 0x12e   :  { %v173_v22 = vpop.f32.mrb[2].mxu0 }
 0x12f   :  { %v177_v23 = vpack.c.bf16 %v171_v20, %v171_v20  ;;  %176 = vst [vmem:[#allocation8] sm:$0xff] %v171_v20  ;;  %v375_v24 = vpop.f32.mrb[3].mxu0 }
 0x131   :  { %393 = vmatmul.mubr.bf16.vlgmr.msra.gmra.mrb[0].mxu1 %v177_v23 }
 0x132   :  { %498 = shalt.err (!%p495_p0)
}
 0x133   :  { %s499_s14 = scalar_lea.hbm %s660_s5, 128 }
 0x134   :  { %p500_p1 = scmp.ne.s32.totalorder %s660_s5, %s499_s14  ;;  %p503_p2 = scmp.lt.u32.totalorder %s499_s14, %s660_s5 }
 0x136   :  { %p505_p3 = pnand %p503_p2, %p500_p1 }
 0x138   :  { %508 = shalt.err (!%p505_p3)
}
 0x139   :  { %299 = dma.vmem_to_hbm [thread:$0]  %s297_s11, 128, %s660_s5, [#allocation4]   ;;  %v329_v25 = vld [vmem:[%s659_s4] ss:$0 sm:$0xff] }
 0x13a   :  { %s547_s22 = smov [#allocation9]  }
 0x13b   :  { %s306_s23 = sshll.u32 %s547_s22, 4  ;;  %s307_s23 = int_to_ptr.vmem [resolvable:$true] %s306_s23 }
 0x13c   :  { %s509_s24 = scalar_lea.vmem %s307_s23, 128  ;;  %p514_p5 = scmp.lt.s32.totalorder %s307_s23, %s307_s23 }
 0x13d   :  { %p510_p4 = scmp.ne.s32.totalorder %s307_s23, %s509_s24  ;;  %p515_p6 = scmp.lt.s32.totalorder %s509_s24, %s509_s24 }
 0x13f   :  { %p516_p7 = por %p515_p6, %p514_p5 }
 0x141   :  { %p517_p8 = pnand %p516_p7, %p510_p4 }
 0x204   :  { %v283_v26 = vpop.f32.mrb[0].mxu1 }
 0x205   :  { %v284_v27 = vadd.f32 %v329_v25, %v283_v26  ;;  %v394_v28 = vpop.f32.mrb[1].mxu1 }
 0x206   :  { %v286_v29 = vpop.f32.mrb[2].mxu1 }
 0x207   :  { %289 = vst [vmem:[#allocation9] sm:$0xff] %v284_v27  ;;  %v395_v30 = vpop.f32.mrb[3].mxu1 }
 0x208   :  { %520 = shalt.err (!%p517_p8)
}
 0x209   :  { %s521_s4 = scalar_lea.hbm %s661_s6, 128 }
 0x20a   :  { %p522_p9 = scmp.ne.s32.totalorder %s661_s6, %s521_s4  ;;  %p525_p10 = scmp.lt.u32.totalorder %s521_s4, %s661_s6 }
 0x20c   :  { %p527_p11 = pnand %p525_p10, %p522_p9 }
 0x20e   :  { %530 = shalt.err (!%p527_p11)
}
 0x20f   :  { %309 = dma.vmem_to_hbm [thread:$0]  %s307_s23, 128, %s661_s6, [#allocation10]  }
 0x210   :  { %535 = dma.done.wait [#allocation4], 128  }
 0x211   :  { %536 = vsyncadd [#allocation4], 4294967168 }
 0x212   :  { %537 = dma.done.wait [#allocation10], 128  }
 0x213   :  { %538 = vsyncadd [#allocation10], 4294967168 }
 0x214   :  { %316 = vsyncpa [#allocation3], 1 }
 0x215   :  { %317 = vsyncpa [#allocation6], 1 }
 0x216   :  { %318 = vsyncpa [#allocation4], 1 }
 0x217   :  { %319 = vsyncpa [#allocation10], 1 }

</bundles_post_ra>
